<compile_context>
chip_gen: v7x
topology: tpu7x:2x2x1
jax: 0.10.0
libtpu: 0.0.40
codegen_flags: <defaults>
</compile_context>

<pallas_src>
import functools

import jax
import jax.numpy as jnp
from jax.experimental import pallas as pl
from jax.experimental.pallas import tpu as pltpu


def _gat_kernel(idx_g_ref, send_r_ref, v_ref, e_ref,
                w_ref, was_ref, war_ref, wae_ref, ba_ref, o_ref):
    # One batch-chunk per grid step; all batches in the chunk are folded into the
    # row (sublane) axis and ALL heads are computed at once.
    V = v_ref[0]               # [Nt, Dn]        Nt = bt*N
    E = e_ref[0]               # [Net, De]       Net = bt*Ne
    idx_g = idx_g_ref[0]       # [2*Net, 1] int32  stacked [send; recv], batch-offset
    send_r = send_r_ref[0]     # [1, Net]   int32  lane-major sender idx (scatter)
    W_all = w_ref[...]         # [Dn, H*Dh]   (== concat_h W[h].T along lanes)
    Was = was_ref[...]         # [H*Dh, H*Dh] block-diag sender att weights (P folded)
    War = war_ref[...]         # [H*Dh, H*Dh] block-diag receiver att weights
    Wae = wae_ref[...]         # [De, H*Dh]   edge-feature att weights (P folded)
    ba = ba_ref[...]           # [1, H*Dh]    attention biases (P folded)

    n_nodes = V.shape[0]
    n_edges = E.shape[0]
    hdh = W_all.shape[1]       # H * Dh

    # Project all heads once for the whole chunk (instead of per edge per head).
    hV = jnp.dot(V, W_all, preferred_element_type=jnp.float32)           # [Nt, H*Dh]

    # Fused sender/receiver gather: one one-hot, one matmul, tile-aligned split
    # (Net is a multiple of 8, so slicing at row Net is free).
    gather_iota = jax.lax.broadcasted_iota(jnp.int32, (2 * n_edges, n_nodes), 1)
    G = (gather_iota == idx_g).astype(jnp.float32)                       # [2*Net, Nt]
    h_sr = jnp.dot(G, hV, preferred_element_type=jnp.float32)            # [2*Net, H*Dh]
    h_s = h_sr[:n_edges]                                                 # [Net, H*Dh]
    h_r = h_sr[n_edges:]                                                 # [Net, H*Dh]

    # Attention Linear over cat([h_s, h_r, E], -1) for all heads, already expanded
    # to per-(head, feature) lanes (expander P was folded into the weights).
    att = (jnp.dot(h_s, Was, preferred_element_type=jnp.float32)
           + jnp.dot(h_r, War, preferred_element_type=jnp.float32)
           + jnp.dot(E, Wae, preferred_element_type=jnp.float32)
           + ba)                                                          # [Net, H*Dh]
    att = jnp.where(att >= 0.0, att, 0.2 * att)                           # LeakyReLU(0.2)
    # Per-chunk max shift: it cancels exactly in num/den, kept only for exp safety.
    att = jnp.exp(att - jnp.max(att, axis=0, keepdims=True))              # [Net, H*Dh]

    # Scatter-sum by sender index, built directly in [Nt, Net] orientation (no .T);
    # numerator and denominator fused into a single matmul.
    scatter_iota = jax.lax.broadcasted_iota(jnp.int32, (n_nodes, n_edges), 0)
    ST = (scatter_iota == send_r).astype(jnp.float32)                     # [Nt, Net]
    scat_in = jnp.concatenate([h_s * att, att], axis=1)                   # [Net, 2*H*Dh]
    scat = jnp.dot(ST, scat_in, preferred_element_type=jnp.float32)       # [Nt, 2*H*Dh]

    # Exact divide (epilogue is one padded vreg block; approx rcp bought nothing and
    # cost ~5e-3 accuracy). Nodes with no outgoing edges: 0 / 1e-8 == 0, as in torch.
    o_ref[0] = scat[:, :hdh] / (scat[:, hdh:] + 1e-8)                     # [Nt, H*Dh]


@functools.partial(jax.jit, static_argnames=("batch_tile",))
def multi_head_gat(V, E, send_idx, recv_idx, W, Wa, ba, *, batch_tile=None):
    B, N, Dn = V.shape
    _, Ne, De = E.shape
    H, Dh, _ = W.shape
    HDh = H * Dh

    # Fold `bt` batches into the row axis per grid step. Default: fold everything
    # (grid=(1,)). For large production B on v7x, pick bt so per-step compute
    # clearly exceeds the ~0.35us step overhead and both TensorCores get work.
    bt = B if batch_tile is None else batch_tile
    assert B % bt == 0, (B, bt)
    G = B // bt
    Nt = bt * N
    Net = bt * Ne

    # --- host-side weight re-layout (tiny, once per call) ---------------------
    # W_all[:, h*Dh + j] = W[h, j, :]   ->  V @ W_all == per-head V @ W[h].T, concat'd
    W_all = jnp.transpose(W, (2, 0, 1)).reshape(Dn, HDh)
    eye_h = jnp.eye(H, dtype=jnp.float32)
    # Per-head expander P[h, h*Dh + j] = 1, folded into the attention weights so the
    # kernel produces [Ne, H*Dh] logits directly (no 4-lane [Ne, H] intermediate).
    P = jnp.repeat(eye_h, Dh, axis=1)                                     # [H, H*Dh]
    Was = (Wa[:, 0, :Dh][:, :, None] * eye_h[:, None, :]).reshape(HDh, H) @ P
    War = (Wa[:, 0, Dh:2 * Dh][:, :, None] * eye_h[:, None, :]).reshape(HDh, H) @ P
    Wae = jnp.transpose(Wa[:, 0, 2 * Dh:], (1, 0)) @ P                    # [De, H*Dh]
    ba_row = ba[:, 0, 0][None, :] @ P                                     # [1, H*Dh]

    # --- fold batch into rows: offset node indices by (their position in chunk)*N
    offs = (jnp.arange(B, dtype=jnp.int32) % bt)[:, None] * N             # [B, 1]
    send_f = (send_idx[..., 0].astype(jnp.int32) + offs).reshape(G, Net)  # [G, Net]
    recv_f = (recv_idx[..., 0].astype(jnp.int32) + offs).reshape(G, Net)
    idx_gather = jnp.concatenate([send_f, recv_f], axis=1)[..., None]     # [G, 2*Net, 1]
    send_row = send_f[:, None, :]                                         # [G, 1, Net]

    V_f = V.reshape(G, Nt, Dn)
    E_f = E.reshape(G, Net, De)

    # TODO(synk): for production graph sizes where Ne*N*4B approaches the v7x VMEM
    # budget, tile Ne as a trailing "arbitrary" grid axis with a resident accumulator.
    out = pl.pallas_call(
        _gat_kernel,
        out_shape=jax.ShapeDtypeStruct((G, Nt, HDh), jnp.float32),
        grid_spec=pltpu.PrefetchScalarGridSpec(
            num_scalar_prefetch=0,
            grid=(G,),
            in_specs=[
                pl.BlockSpec((1, 2 * Net, 1), lambda g: (g, 0, 0)),       # gather idx
                pl.BlockSpec((1, 1, Net), lambda g: (g, 0, 0)),           # scatter idx
                pl.BlockSpec((1, Nt, Dn), lambda g: (g, 0, 0)),           # V
                pl.BlockSpec((1, Net, De), lambda g: (g, 0, 0)),          # E
                pl.BlockSpec((Dn, HDh), lambda g: (0, 0)),                # W_all
                pl.BlockSpec((HDh, HDh), lambda g: (0, 0)),               # Was
                pl.BlockSpec((HDh, HDh), lambda g: (0, 0)),               # War
                pl.BlockSpec((De, HDh), lambda g: (0, 0)),                # Wae
                pl.BlockSpec((1, HDh), lambda g: (0, 0)),                 # ba
            ],
            out_specs=pl.BlockSpec((1, Nt, HDh), lambda g: (g, 0, 0)),
        ),
        compiler_params=pltpu.CompilerParams(
            dimension_semantics=("parallel",)),
    )(idx_gather, send_row, V_f, E_f, W_all, Was, War, Wae, ba_row)

    # Output is already [B, N, H*Dh] == torch.cat(heads, dim=-1); no transpose needed.
    return out.reshape(B, N, HDh)


def multi_head_gat_reference(V, E, send_idx, recv_idx, W, Wa, ba):
    """Pure-JAX reference matching the PyTorch forward semantics."""
    B, N, Dn = V.shape
    H, Dh, _ = W.shape
    send = send_idx[..., 0]   # [B, Ne]
    recv = recv_idx[..., 0]
    b_ix = jnp.arange(B)[:, None]
    senders = V[b_ix, send]       # [B, Ne, Dn]
    receivers = V[b_ix, recv]     # [B, Ne, Dn]
    heads = []
    for h in range(H):
        h_s = senders @ W[h].T        # [B, Ne, Dh]
        h_r = receivers @ W[h].T
        feat = jnp.concatenate([h_s, h_r, E], axis=-1)
        att = feat @ Wa[h, 0] + ba[h, 0, 0]          # [B, Ne]
        att = att[..., None]
        att = jnp.where(att >= 0, att, 0.2 * att)    # LeakyReLU(0.2)
        att = jnp.exp(att - jnp.max(att, axis=1, keepdims=True))
        num = jnp.zeros((B, N, Dh), jnp.float32).at[b_ix, send].add(att * h_s)
        den = jnp.zeros((B, N, 1), jnp.float32).at[b_ix, send].add(att)
        heads.append(num / (den + 1e-8))
    return jnp.concatenate(heads, axis=-1)


if __name__ == "__main__":
    B, N, Dn = 2, 16, 32          # batch, nodes, node_size
    Ne, De = 32, 128              # edges, edge-feature dim (fixed 128 by the module)
    output_size, H = 32, 4        # multi-head output size, n_heads
    Dh = output_size // H

    key = jax.random.PRNGKey(0)
    k = jax.random.split(key, 7)
    V = jax.random.normal(k[0], (B, N, Dn), jnp.float32)
    E = jax.random.normal(k[1], (B, Ne, De), jnp.float32)
    send_idx = jax.random.randint(k[2], (B, Ne, 1), 0, N, jnp.int32)
    recv_idx = jax.random.randint(k[3], (B, Ne, 1), 0, N, jnp.int32)
    W = jax.random.normal(k[4], (H, Dh, Dn), jnp.float32) * 0.1
    Wa = jax.random.normal(k[5], (H, 1, 2 * Dh + De), jnp.float32) * 0.1
    ba = jax.random.normal(k[6], (H, 1, 1), jnp.float32) * 0.1

    out = jax.block_until_ready(multi_head_gat(V, E, send_idx, recv_idx, W, Wa, ba))
    ref = jax.block_until_ready(
        multi_head_gat_reference(V, E, send_idx, recv_idx, W, Wa, ba))

    assert out.shape == (B, N, output_size), out.shape
    # Exact divide in the epilogue -> only matmul-reassociation noise remains.
    assert jnp.allclose(out, ref, atol=1e-4, rtol=1e-4), float(jnp.max(jnp.abs(out - ref)))
    print("KERNEL_OK")
</pallas_src>

<mosaic_0001>
module attributes {stable_mosaic.version = 11 : i64} {
  func.func @_gat_kernel(%arg0: i32, %arg1: memref<1x128x1xi32, #tpu.memory_space<vmem>>, %arg2: memref<1x1x64xi32, #tpu.memory_space<vmem>>, %arg3: memref<1x32x32xf32, #tpu.memory_space<vmem>>, %arg4: memref<1x64x128xf32, #tpu.memory_space<vmem>>, %arg5: memref<32x32xf32, #tpu.memory_space<vmem>>, %arg6: memref<32x32xf32, #tpu.memory_space<vmem>>, %arg7: memref<32x32xf32, #tpu.memory_space<vmem>>, %arg8: memref<128x32xf32, #tpu.memory_space<vmem>>, %arg9: memref<1x32xf32, #tpu.memory_space<vmem>>, %arg10: memref<1x32x32xf32, #tpu.memory_space<vmem>>) attributes {dimension_semantics = [#tpu.dimension_semantics<parallel>], iteration_bounds = array<i64: 1>, scalar_prefetch = 0 : i64, scratch_operands = 0 : i64, tpu.core_type = #tpu.core_type<tc>, window_params = [{transform_indices = @transform_0, window_bounds = array<i64: 1, 128, 1>}, {transform_indices = @transform_1, window_bounds = array<i64: 1, 1, 64>}, {transform_indices = @transform_2, window_bounds = array<i64: 1, 32, 32>}, {transform_indices = @transform_3, window_bounds = array<i64: 1, 64, 128>}, {pipeline_mode = #tpu.pipeline_mode<synchronous>, transform_indices = @transform_4, window_bounds = array<i64: 32, 32>}, {pipeline_mode = #tpu.pipeline_mode<synchronous>, transform_indices = @transform_5, window_bounds = array<i64: 32, 32>}, {pipeline_mode = #tpu.pipeline_mode<synchronous>, transform_indices = @transform_6, window_bounds = array<i64: 32, 32>}, {pipeline_mode = #tpu.pipeline_mode<synchronous>, transform_indices = @transform_7, window_bounds = array<i64: 128, 32>}, {pipeline_mode = #tpu.pipeline_mode<synchronous>, transform_indices = @transform_8, window_bounds = array<i64: 1, 32>}, {transform_indices = @transform_9, window_bounds = array<i64: 1, 32, 32>}]} {
    %c0 = arith.constant 0 : index
    %c0_0 = arith.constant 0 : index
    %c0_1 = arith.constant 0 : index
    %0 = vector.load %arg3[%c0, %c0_0, %c0_1] : memref<1x32x32xf32, #tpu.memory_space<vmem>>, vector<1x32x32xf32>
    %1 = vector.shape_cast %0 : vector<1x32x32xf32> to vector<32x32xf32>
    %c0_2 = arith.constant 0 : index
    %c0_3 = arith.constant 0 : index
    %c0_4 = arith.constant 0 : index
    %2 = vector.load %arg4[%c0_2, %c0_3, %c0_4] : memref<1x64x128xf32, #tpu.memory_space<vmem>>, vector<1x64x128xf32>
    %3 = vector.shape_cast %2 : vector<1x64x128xf32> to vector<64x128xf32>
    %c0_5 = arith.constant 0 : index
    %c0_6 = arith.constant 0 : index
    %c0_7 = arith.constant 0 : index
    %4 = vector.load %arg1[%c0_5, %c0_6, %c0_7] : memref<1x128x1xi32, #tpu.memory_space<vmem>>, vector<1x128x1xi32>
    %5 = vector.shape_cast %4 : vector<1x128x1xi32> to vector<128x1xi32>
    %c0_8 = arith.constant 0 : index
    %c0_9 = arith.constant 0 : index
    %c0_10 = arith.constant 0 : index
    %6 = vector.load %arg2[%c0_8, %c0_9, %c0_10] : memref<1x1x64xi32, #tpu.memory_space<vmem>>, vector<1x1x64xi32>
    %7 = vector.shape_cast %6 : vector<1x1x64xi32> to vector<1x64xi32>
    %c0_11 = arith.constant 0 : index
    %c0_12 = arith.constant 0 : index
    %8 = vector.load %arg5[%c0_11, %c0_12] : memref<32x32xf32, #tpu.memory_space<vmem>>, vector<32x32xf32>
    %c0_13 = arith.constant 0 : index
    %c0_14 = arith.constant 0 : index
    %9 = vector.load %arg6[%c0_13, %c0_14] : memref<32x32xf32, #tpu.memory_space<vmem>>, vector<32x32xf32>
    %c0_15 = arith.constant 0 : index
    %c0_16 = arith.constant 0 : index
    %10 = vector.load %arg7[%c0_15, %c0_16] : memref<32x32xf32, #tpu.memory_space<vmem>>, vector<32x32xf32>
    %c0_17 = arith.constant 0 : index
    %c0_18 = arith.constant 0 : index
    %11 = vector.load %arg8[%c0_17, %c0_18] : memref<128x32xf32, #tpu.memory_space<vmem>>, vector<128x32xf32>
    %c0_19 = arith.constant 0 : index
    %c0_20 = arith.constant 0 : index
    %12 = vector.load %arg9[%c0_19, %c0_20] : memref<1x32xf32, #tpu.memory_space<vmem>>, vector<1x32xf32>
    %cst = arith.constant dense<0.000000e+00> : vector<32x32xf32>
    %13 = tpu.matmul %1, %8, %cst {dimension_numbers = #tpu.dot_dimension_numbers<[1], [0], [0], [1], [0, 0, 1, 1], [], []>} : vector<32x32xf32>, vector<32x32xf32>, vector<32x32xf32> -> vector<32x32xf32>
    %14 = tpu.iota {dimensions = array<i32: 1>} : vector<128x32xi32>
    %15 = vector.broadcast %5 : vector<128x1xi32> to vector<128x32xi32>
    %16 = arith.cmpi eq, %14, %15 : vector<128x32xi32>
    %17 = arith.extui %16 : vector<128x32xi1> to vector<128x32xi32>
    %18 = arith.sitofp %17 : vector<128x32xi32> to vector<128x32xf32>
    %cst_21 = arith.constant dense<0.000000e+00> : vector<128x32xf32>
    %19 = tpu.matmul %18, %13, %cst_21 {dimension_numbers = #tpu.dot_dimension_numbers<[1], [0], [0], [1], [0, 0, 1, 1], [], []>} : vector<128x32xf32>, vector<32x32xf32>, vector<128x32xf32> -> vector<128x32xf32>
    %20 = vector.extract_strided_slice %19 {offsets = [0, 0], sizes = [64, 32], strides = [1, 1]} : vector<128x32xf32> to vector<64x32xf32>
    %21 = vector.extract_strided_slice %19 {offsets = [64, 0], sizes = [64, 32], strides = [1, 1]} : vector<128x32xf32> to vector<64x32xf32>
    %cst_22 = arith.constant dense<0.000000e+00> : vector<64x32xf32>
    %22 = tpu.matmul %20, %9, %cst_22 {dimension_numbers = #tpu.dot_dimension_numbers<[1], [0], [0], [1], [0, 0, 1, 1], [], []>} : vector<64x32xf32>, vector<32x32xf32>, vector<64x32xf32> -> vector<64x32xf32>
    %cst_23 = arith.constant dense<0.000000e+00> : vector<64x32xf32>
    %23 = tpu.matmul %21, %10, %cst_23 {dimension_numbers = #tpu.dot_dimension_numbers<[1], [0], [0], [1], [0, 0, 1, 1], [], []>} : vector<64x32xf32>, vector<32x32xf32>, vector<64x32xf32> -> vector<64x32xf32>
    %24 = arith.addf %22, %23 : vector<64x32xf32>
    %cst_24 = arith.constant dense<0.000000e+00> : vector<64x32xf32>
    %25 = tpu.matmul %3, %11, %cst_24 {dimension_numbers = #tpu.dot_dimension_numbers<[1], [0], [0], [1], [0, 0, 1, 1], [], []>} : vector<64x128xf32>, vector<128x32xf32>, vector<64x32xf32> -> vector<64x32xf32>
    %26 = arith.addf %24, %25 : vector<64x32xf32>
    %27 = vector.broadcast %12 : vector<1x32xf32> to vector<64x32xf32>
    %28 = arith.addf %26, %27 : vector<64x32xf32>
    %cst_25 = arith.constant 0.000000e+00 : f32
    %29 = vector.broadcast %cst_25 : f32 to vector<64x32xf32>
    %30 = arith.cmpf oge, %28, %29 : vector<64x32xf32>
    %cst_26 = arith.constant 2.000000e-01 : f32
    %31 = vector.broadcast %cst_26 : f32 to vector<64x32xf32>
    %32 = arith.mulf %31, %28 : vector<64x32xf32>
    %33 = arith.select %30, %28, %32 : vector<64x32xi1>, vector<64x32xf32>
    %cst_27 = arith.constant dense<0xFF800000> : vector<32xf32>
    %34 = vector.multi_reduction <maximumf>, %33, %cst_27 [0] : vector<64x32xf32> to vector<32xf32>
    %35 = vector.shape_cast %34 : vector<32xf32> to vector<1x32xf32>
    %36 = vector.broadcast %35 : vector<1x32xf32> to vector<64x32xf32>
    %37 = arith.subf %33, %36 : vector<64x32xf32>
    %38 = math.exp %37 : vector<64x32xf32>
    %39 = tpu.iota {dimensions = array<i32: 0>} : vector<32x64xi32>
    %40 = vector.broadcast %7 : vector<1x64xi32> to vector<32x64xi32>
    %41 = arith.cmpi eq, %39, %40 : vector<32x64xi32>
    %42 = arith.extui %41 : vector<32x64xi1> to vector<32x64xi32>
    %43 = arith.sitofp %42 : vector<32x64xi32> to vector<32x64xf32>
    %44 = arith.mulf %20, %38 : vector<64x32xf32>
    %45 = tpu.concatenate %44, %38 in 1 : vector<64x32xf32>, vector<64x32xf32> -> vector<64x64xf32>
    %cst_28 = arith.constant dense<0.000000e+00> : vector<32x64xf32>
    %46 = tpu.matmul %43, %45, %cst_28 {dimension_numbers = #tpu.dot_dimension_numbers<[1], [0], [0], [1], [0, 0, 1, 1], [], []>} : vector<32x64xf32>, vector<64x64xf32>, vector<32x64xf32> -> vector<32x64xf32>
    %47 = vector.extract_strided_slice %46 {offsets = [0, 0], sizes = [32, 32], strides = [1, 1]} : vector<32x64xf32> to vector<32x32xf32>
    %48 = vector.extract_strided_slice %46 {offsets = [0, 32], sizes = [32, 32], strides = [1, 1]} : vector<32x64xf32> to vector<32x32xf32>
    %cst_29 = arith.constant 9.99999993E-9 : f32
    %49 = vector.broadcast %cst_29 : f32 to vector<32x32xf32>
    %50 = arith.addf %48, %49 : vector<32x32xf32>
    %51 = arith.divf %47, %50 : vector<32x32xf32>
    %c0_30 = arith.constant 0 : index
    %c0_31 = arith.constant 0 : index
    %c0_32 = arith.constant 0 : index
    %52 = vector.load %arg10[%c0_30, %c0_31, %c0_32] : memref<1x32x32xf32, #tpu.memory_space<vmem>>, vector<1x32x32xf32>
    %53 = vector.shape_cast %52 : vector<1x32x32xf32> to vector<32x32xf32>
    %54 = vector.shape_cast %51 : vector<32x32xf32> to vector<1x32x32xf32>
    tpu.vector_store %arg10[%c0_30, %c0_31, %c0_32], %54 {strides = array<i32>} : memref<1x32x32xf32, #tpu.memory_space<vmem>>, vector<1x32x32xf32>,
    return
  }
  func.func @transform_0(%arg0: i32) -> (i32, i32, i32) {
    %c0_i32 = arith.constant 0 : i32
    %c0_i32_0 = arith.constant 0 : i32
    %c0_i32_1 = arith.constant 0 : i32
    return %arg0, %c0_i32, %c0_i32_0 : i32, i32, i32
  }
  func.func @transform_1(%arg0: i32) -> (i32, i32, i32) {
    %c0_i32 = arith.constant 0 : i32
    %c0_i32_0 = arith.constant 0 : i32
    %c0_i32_1 = arith.constant 0 : i32
    return %arg0, %c0_i32, %c0_i32_0 : i32, i32, i32
  }
  func.func @transform_2(%arg0: i32) -> (i32, i32, i32) {
    %c0_i32 = arith.constant 0 : i32
    %c0_i32_0 = arith.constant 0 : i32
    %c0_i32_1 = arith.constant 0 : i32
    return %arg0, %c0_i32, %c0_i32_0 : i32, i32, i32
  }
  func.func @transform_3(%arg0: i32) -> (i32, i32, i32) {
    %c0_i32 = arith.constant 0 : i32
    %c0_i32_0 = arith.constant 0 : i32
    %c0_i32_1 = arith.constant 0 : i32
    return %arg0, %c0_i32, %c0_i32_0 : i32, i32, i32
  }
  func.func @transform_4(%arg0: i32) -> (i32, i32) {
    %c0_i32 = arith.constant 0 : i32
    %c0_i32_0 = arith.constant 0 : i32
    %c0_i32_1 = arith.constant 0 : i32
    return %c0_i32, %c0_i32_0 : i32, i32
  }
  func.func @transform_5(%arg0: i32) -> (i32, i32) {
    %c0_i32 = arith.constant 0 : i32
    %c0_i32_0 = arith.constant 0 : i32
    %c0_i32_1 = arith.constant 0 : i32
    return %c0_i32, %c0_i32_0 : i32, i32
  }
  func.func @transform_6(%arg0: i32) -> (i32, i32) {
    %c0_i32 = arith.constant 0 : i32
    %c0_i32_0 = arith.constant 0 : i32
    %c0_i32_1 = arith.constant 0 : i32
    return %c0_i32, %c0_i32_0 : i32, i32
  }
  func.func @transform_7(%arg0: i32) -> (i32, i32) {
    %c0_i32 = arith.constant 0 : i32
    %c0_i32_0 = arith.constant 0 : i32
    %c0_i32_1 = arith.constant 0 : i32
    return %c0_i32, %c0_i32_0 : i32, i32
  }
  func.func @transform_8(%arg0: i32) -> (i32, i32) {
    %c0_i32 = arith.constant 0 : i32
    %c0_i32_0 = arith.constant 0 : i32
    %c0_i32_1 = arith.constant 0 : i32
    return %c0_i32, %c0_i32_0 : i32, i32
  }
  func.func @transform_9(%arg0: i32) -> (i32, i32, i32) {
    %c0_i32 = arith.constant 0 : i32
    %c0_i32_0 = arith.constant 0 : i32
    %c0_i32_1 = arith.constant 0 : i32
    return %arg0, %c0_i32, %c0_i32_0 : i32, i32, i32
  }
}

</mosaic_0001>

<bundles_post_ra>
// kernel: multi_head_gat.1
= control target key start
LH: loop header
LB: loop body
LE: loop exit
PB: predicated region body
PF: predicated region fallthrough
CT: control target
= control target key end

     0   :  { %vm91_vm0 = vcmask 261120   ;;  %v1624_v6 = vmov 0   ;;  %s2006_s0 = inlined_call_operand.vmem [shape: s32[1,128,1], index: 0, kind: input, shape index: {}]   ;;  %s2007_s1 = inlined_call_operand.vmem [shape: s32[1,1,64], index: 1, kind: input, shape index: {}]   ;;  %s2008_s2 = inlined_call_operand.vmem [shape: f32[1,32,32], index: 2, kind: input, shape index: {}]   ;;  %s2009_s3 = inlined_call_operand.vmem [shape: f32[1,64,128], index: 3, kind: input, shape index: {}]   ;;  %s2010_s4 = inlined_call_operand.vmem [shape: f32[32,32], index: 4, kind: input, shape index: {}]   ;;  %s2011_s5 = inlined_call_operand.vmem [shape: f32[32,32], index: 5, kind: input, shape index: {}]   ;;  %s2012_s6 = inlined_call_operand.vmem [shape: f32[32,32], index: 6, kind: input, shape index: {}]   ;;  %s2013_s7 = inlined_call_operand.vmem [shape: f32[128,32], index: 7, kind: input, shape index: {}]   ;;  %s2014_s8 = inlined_call_operand.vmem [shape: f32[1,32], index: 8, kind: input, shape index: {}]   ;;  %s2015_s9 = inlined_call_operand.hbm [shape: f32[1,32,32], index: 9, kind: output, shape index: {}]  }
   0x1   :  { %v62_v0 = vld [vmem:[%s2010_s4] sm:$0xff]  ;;  %v63_v1 = vld [vmem:[%s2010_s4 + $0x8] sm:$0xff]  ;;  %v64_v2 = vld [vmem:[%s2010_s4 + $0x10] sm:$0xff]  ;;  %1554 = vset.pattern.permute.xlu0 %v1624_v6  ;;  %1555 = vset.pattern.permute.xlu1 %v1624_v6 }
   0x2   :  { %v1451_v3 = vpack.c.bf16 %v63_v1, %v62_v0  ;;  %v65_v4 = vld [vmem:[%s2010_s4 + $0x18] sm:$0xff]  ;;  %v33_v5 = vld [vmem:[%s2008_s2] sm:$0xff]  ;;  %v46_v9 = vld [vmem:[%s2006_s0 + $0x8] sm:$0xff] }
   0x3   :  { %v1455_v7 = vpack.c.bf16 %v65_v4, %v64_v2  ;;  %1307 = vmatprep.mubr.msk.f32.mxu0 %vm91_vm0, %v33_v5  ;;  %v45_v8 = vld [vmem:[%s2006_s0] sm:$0xff]  ;;  %v47_v10 = vld [vmem:[%s2006_s0 + $0x10] sm:$0xff]  ;;  %v48_v11 = vld [vmem:[%s2006_s0 + $0x18] sm:$0xff] }
   0x4   :  { %1452 = vmatprep.subr.bf16.mxu0 %v1451_v3  ;;  %192 = vperm.xlu0 %1554, %v45_v8   ;;  %v34_v12 = vld [vmem:[%s2008_s2 + $0x8] sm:$0xff]  ;;  %v49_v13 = vld [vmem:[%s2006_s0 + $0x20] sm:$0xff] }
   0x5   :  { %1454 = vmatpush3.bf16.msra.mxu0 %v1451_v3  ;;  %198 = vperm.xlu1 %1555, %v47_v10  }
   0x6   :  { %1456 = vmatprep.subr.bf16.mxu0 %v1455_v7 }
   0x8   :  { %195 = vperm.xlu0 %1554, %v46_v9  }
   0x9   :  { %1458 = vmatpush3.bf16.msra.mxu0 %v1455_v7 }
   0xa   :  { %14 = vsyncpa [#allocation3], 0  ;;  %v35_v14 = vld [vmem:[%s2008_s2 + $0x10] sm:$0xff]  ;;  %201 = vperm.xlu1 %1555, %v48_v11   ;;  %v50_v15 = vld [vmem:[%s2006_s0 + $0x28] sm:$0xff]  ;;  %v189_v27 = vlaneseq  ;;  %v1625_v30 = vmov 0.0   ;;  %s1628_s4 = smov [#allocation2]  }
   0xb   :  { %v36_v16 = vld [vmem:[%s2008_s2 + $0x18] sm:$0xff]  ;;  %v51_v17 = vld [vmem:[%s2006_s0 + $0x30] sm:$0xff]  ;;  %v53_v19 = vld [vmem:[%s2006_s0 + $0x40] sm:$0xff]  ;;  %s1138_s23 = sshll.u32 %s1628_s4, 4  ;;  %s1139_s23 = int_to_ptr.vmem [resolvable:$true] %s1138_s23 }
   0xc   :  { %1308 = vmatmul.mubr.msk.f32.vlgmr.msra.gmra.mrb[0].mxu0 %vm91_vm0, %v34_v12  ;;  %204 = vperm.xlu0 %1554, %v49_v13   ;;  %v52_v18 = vld [vmem:[%s2006_s0 + $0x38] sm:$0xff]  ;;  %v54_v20 = vld [vmem:[%s2006_s0 + $0x48] sm:$0xff]  ;;  %v55_v21 = vld [vmem:[%s2006_s0 + $0x50] sm:$0xff]  ;;  %v1758_v28 = vand.u32 127, %v189_v27  ;;  %s1600_s24 = scalar_lea.vmem %s1139_s23, 512  ;;  %p1605_p1 = scmp.lt.s32.totalorder %s1139_s23, %s1139_s23 }
   0xd   :  { %1310 = vmatprep.mubr.msk.f32.mxu0 %vm91_vm0, %v35_v14  ;;  %v56_v22 = vld [vmem:[%s2006_s0 + $0x58] sm:$0xff]  ;;  %v57_v23 = vld [vmem:[%s2006_s0 + $0x60] sm:$0xff]  ;;  %v58_v24 = vld [vmem:[%s2006_s0 + $0x68] sm:$0xff]  ;;  %p1601_p0 = scmp.ne.s32.totalorder %s1139_s23, %s1600_s24  ;;  %p1606_p2 = scmp.lt.s32.totalorder %s1600_s24, %s1600_s24 }
   0xe   :  { %207 = vperm.xlu1 %1555, %v50_v15   ;;  %v59_v25 = vld [vmem:[%s2006_s0 + $0x70] sm:$0xff]  ;;  %v60_v26 = vld [vmem:[%s2006_s0 + $0x78] sm:$0xff]  ;;  %v66_v32 = vld [vmem:[%s2011_s5] sm:$0xff] }
   0xf   :  { %v67_v33 = vld [vmem:[%s2011_s5 + $0x8] sm:$0xff]  ;;  %v68_v34 = vld [vmem:[%s2011_s5 + $0x10] sm:$0xff]  ;;  %v69_v36 = vld [vmem:[%s2011_s5 + $0x18] sm:$0xff]  ;;  %p1607_p3 = por %p1606_p2, %p1605_p1 }
  0x10   :  { %1311 = vmatmul.mubr.msk.f32.gmra.mrb[2].mxu0 %vm91_vm0, %v36_v16  ;;  %210 = vperm.xlu0 %1554, %v51_v17   ;;  %v1475_v35 = vpack.c.bf16 %v67_v33, %v66_v32  ;;  %v1479_v37 = vpack.c.bf16 %v69_v36, %v68_v34  ;;  %v74_v10 = vld [vmem:[%s2013_s7] sm:$0xff]  ;;  %v75_v11 = vld [vmem:[%s2013_s7 + $0x8] sm:$0xff]  ;;  %v72_v16 = vld [vmem:[%s2012_s6 + $0x10] sm:$0xff] }
  0x11   :  { %v1483_v12 = vpack.c.bf16 %v75_v11, %v74_v10  ;;  %v70_v13 = vld [vmem:[%s2012_s6] sm:$0xff]  ;;  %v71_v14 = vld [vmem:[%s2012_s6 + $0x8] sm:$0xff]  ;;  %v73_v17 = vld [vmem:[%s2012_s6 + $0x18] sm:$0xff]  ;;  %p1608_p4 = pnand %p1607_p3, %p1601_p0 }
  0x12   :  { %213 = vperm.xlu1 %1555, %v52_v18   ;;  %1476 = vmatprep.subr.bf16.mxu0 %v1475_v35  ;;  %v1467_v15 = vpack.c.bf16 %v71_v14, %v70_v13  ;;  %v1471_v18 = vpack.c.bf16 %v73_v17, %v72_v16  ;;  %v81_v32 = vld [vmem:[%s2013_s7 + $0x38] sm:$0xff]  ;;  %v82_v36 = vld [vmem:[%s2013_s7 + $0x40] sm:$0xff] }
  0x13   :  { %1478 = vmatpush3.bf16.msra.mxu0 %v1475_v35  ;;  %v1201_v10 = vld [vmem:[%s2014_s8] ss:$0 sm:$0xff] }
  0x14   :  { %216 = vperm.xlu0 %1554, %v53_v19   ;;  %1480 = vmatprep.subr.bf16.mxu0 %v1479_v37  ;;  %v76_v19 = vld [vmem:[%s2013_s7 + $0x10] sm:$0xff] }
  0x16   :  { %219 = vperm.xlu1 %1555, %v54_v20   ;;  %v77_v20 = vld [vmem:[%s2013_s7 + $0x18] sm:$0xff] }
  0x17   :  { %1482 = vmatpush3.bf16.msra.mxu0 %v1479_v37  ;;  %v83_v37 = vld [vmem:[%s2013_s7 + $0x48] sm:$0xff] }
  0x18   :  { %222 = vperm.xlu0 %1554, %v55_v21   ;;  %1484 = vmatprep.subr.bf16.mxu0 %v1483_v12 }
  0x1a   :  { %225 = vperm.xlu1 %1555, %v56_v22  }
  0x1c   :  { %228 = vperm.xlu0 %1554, %v57_v23   ;;  %v1487_v23 = vpack.c.bf16 %v77_v20, %v76_v19 }
  0x1e   :  { %231 = vperm.xlu1 %1555, %v58_v24   ;;  %v78_v24 = vld [vmem:[%s2013_s7 + $0x20] sm:$0xff] }
  0x20   :  { %234 = vperm.xlu0 %1554, %v59_v25   ;;  %v79_v25 = vld [vmem:[%s2013_s7 + $0x28] sm:$0xff] }
  0x22   :  { %237 = vperm.xlu1 %1555, %v60_v26  }
  0x83   :  { %v193_v29 = vpop.permute.xlu0 %192 }
  0x84   :  { %vm239_vm1 = vcmp.eq.s32.totalorder %v1758_v28, %v193_v29  ;;  %v199_v38 = vpop.permute.xlu1 %198  ;;  %v1491_v29 = vpack.c.bf16 %v79_v25, %v78_v24 }
  0x85   :  { %v1153_v31 = vsel %vm239_vm1, 1.0, %v1625_v30  ;;  %vm241_vm2 = vcmp.eq.s32.totalorder %v1758_v28, %v199_v38 }
  0x86   :  { %1321 = vmatprep.mubr.msk.f32.mxu1 %vm91_vm0, %v1153_v31  ;;  %v1155_v51 = vsel %vm241_vm2, 1.0, %v1625_v30  ;;  %v80_v31 = vld [vmem:[%s2013_s7 + $0x30] sm:$0xff] }
  0x87   :  { %v196_v39 = vpop.permute.xlu0 %195  ;;  %v1495_v35 = vpack.c.bf16 %v81_v32, %v80_v31 }
  0x88   :  { %vm240_vm3 = vcmp.eq.s32.totalorder %v1758_v28, %v196_v39 }
  0x89   :  { %v202_v40 = vpop.permute.xlu1 %201  ;;  %v1154_v52 = vsel %vm240_vm3, 1.0, %v1625_v30 }
  0x8a   :  { %vm242_vm4 = vcmp.eq.s32.totalorder %v1758_v28, %v202_v40  ;;  %v1499_v40 = vpack.c.bf16 %v83_v37, %v82_v36 }
  0x8b   :  { %v205_v41 = vpop.permute.xlu0 %204  ;;  %v1156_v54 = vsel %vm242_vm4, 1.0, %v1625_v30 }
  0x8c   :  { %vm243_vm5 = vcmp.eq.s32.totalorder %v1758_v28, %v205_v41  ;;  %v37_v41 = vld [vmem:[%s2009_s3] sm:$0xff] }
  0x8d   :  { %v208_v45 = vpop.permute.xlu1 %207  ;;  %v1157_v56 = vsel %vm243_vm5, 1.0, %v1625_v30 }
  0x8e   :  { %vm244_vm6 = vcmp.eq.s32.totalorder %v1758_v28, %v208_v45 }
  0x8f   :  { %v211_v48 = vpop.permute.xlu0 %210  ;;  %v1158_v57 = vsel %vm244_vm6, 1.0, %v1625_v30 }
  0x90   :  { %vm245_vm7 = vcmp.eq.s32.totalorder %v1758_v28, %v211_v48  ;;  %v87_v48 = vld [vmem:[%s2013_s7 + $0x68] sm:$0xff] }
  0x91   :  { %v214_v50 = vpop.permute.xlu1 %213  ;;  %v1159_v59 = vsel %vm245_vm7, 1.0, %v1625_v30 }
  0x92   :  { %vm246_vm8 = vcmp.eq.s32.totalorder %v1758_v28, %v214_v50 }
  0x93   :  { %v217_v53 = vpop.permute.xlu0 %216  ;;  %v1160_v60 = vsel %vm246_vm8, 1.0, %v1625_v30 }
  0x94   :  { %vm247_vm9 = vcmp.eq.s32.totalorder %v1758_v28, %v217_v53  ;;  %v89_v53 = vld [vmem:[%s2013_s7 + $0x78] sm:$0xff] }
  0x95   :  { %v220_v55 = vpop.permute.xlu1 %219  ;;  %v1161_v62 = vsel %vm247_vm9, 1.0, %v1625_v30 }
  0x96   :  { %vm248_vm10 = vcmp.eq.s32.totalorder %v1758_v28, %v220_v55 }
  0x97   :  { %v223_v58 = vpop.permute.xlu0 %222  ;;  %v1162_v0 = vsel %vm248_vm10, 1.0, %v1625_v30  ;;  %vm1003_vm10 = vcmask 523264  }
  0x98   :  { %vm249_vm11 = vcmp.eq.s32.totalorder %v1758_v28, %v223_v58 }
  0x99   :  { %v226_v61 = vpop.permute.xlu1 %225  ;;  %v1163_v2 = vsel %vm249_vm11, 1.0, %v1625_v30 }
  0x9a   :  { %vm250_vm12 = vcmp.eq.s32.totalorder %v1758_v28, %v226_v61  ;;  %v40_v61 = vld [vmem:[%s2009_s3 + $0x18] sm:$0xff] }
  0x9b   :  { %v229_v63 = vpop.permute.xlu0 %228  ;;  %v1164_v4 = vsel %vm250_vm12, 1.0, %v1625_v30 }
  0x9c   :  { %vm251_vm13 = vcmp.eq.s32.totalorder %v1758_v28, %v229_v63  ;;  %v42_v63 = vld [vmem:[%s2009_s3 + $0x28] sm:$0xff] }
  0x9d   :  { %v232_v1 = vpop.permute.xlu1 %231  ;;  %v1165_v5 = vsel %vm251_vm13, 1.0, %v1625_v30 }
  0x9e   :  { %vm252_vm14 = vcmp.eq.s32.totalorder %v1758_v28, %v232_v1  ;;  %v44_v1 = vld [vmem:[%s2009_s3 + $0x38] sm:$0xff] }
  0x9f   :  { %v235_v3 = vpop.permute.xlu0 %234  ;;  %v1166_v7 = vsel %vm252_vm14, 1.0, %v1625_v30 }
  0xa0   :  { %vm253_vm15 = vcmp.eq.s32.totalorder %v1758_v28, %v235_v3 }
  0xa1   :  { %v238_v6 = vpop.permute.xlu1 %237  ;;  %v1167_v8 = vsel %vm253_vm15, 1.0, %v1625_v30 }
  0xa2   :  { %vm254_vm1 = vcmp.eq.s32.totalorder %v1758_v28, %v238_v6 }
  0xa3   :  { %v1168_v9 = vsel %vm254_vm1, 1.0, %v1625_v30 }
  0xdf   :  { %v1309_v42 = vpop.f32.mrb[0].mxu0 }
  0xe0   :  { %v170_v43 = vpop.f32.mrb[1].mxu0 }
  0xe1   :  { %v1459_v44 = vpack.c.bf16 %v1309_v42, %v170_v43  ;;  %v84_v42 = vld [vmem:[%s2013_s7 + $0x50] sm:$0xff]  ;;  %v85_v43 = vld [vmem:[%s2013_s7 + $0x58] sm:$0xff] }
  0xe3   :  { %v1312_v46 = vpop.f32.mrb[2].mxu0  ;;  %1460 = vmatprep.subr.bf16.mxu1 %v1459_v44 }
  0xe4   :  { %v180_v47 = vpop.f32.mrb[3].mxu0  ;;  %1462 = vmatpush3.bf16.msra.mxu1 %v1459_v44 }
  0xe5   :  { %v1463_v49 = vpack.c.bf16 %v1312_v46, %v180_v47  ;;  %v1503_v46 = vpack.c.bf16 %v85_v43, %v84_v42  ;;  %v86_v47 = vld [vmem:[%s2013_s7 + $0x60] sm:$0xff] }
  0xe7   :  { %1464 = vmatprep.subr.bf16.mxu1 %v1463_v49 }
  0xe8   :  { %1466 = vmatpush3.bf16.msra.mxu1 %v1463_v49 }
  0xe9   :  { %1468 = vmatprep.subr.bf16.mxu1 %v1467_v15 }
  0xeb   :  { %1322 = vmatmul.mubr.msk.f32.vlgmr.msra.gmra.mrb[0].mxu1 %vm91_vm0, %v1154_v52  ;;  %v88_v52 = vld [vmem:[%s2013_s7 + $0x70] sm:$0xff] }
  0xec   :  { %1324 = vmatprep.mubr.msk.f32.mxu1 %vm91_vm0, %v1155_v51  ;;  %1470 = vmatpush3.bf16.msra.mxu1 %v1467_v15  ;;  %v1507_v51 = vpack.c.bf16 %v87_v48, %v86_v47 }
  0xed   :  { %1472 = vmatprep.subr.bf16.mxu1 %v1471_v18 }
  0xef   :  { %1325 = vmatmul.mubr.msk.f32.gmra.mrb[2].mxu1 %vm91_vm0, %v1156_v54 }
  0xf0   :  { %1327 = vmatprep.mubr.msk.f32.mxu1 %vm91_vm0, %v1157_v56  ;;  %1474 = vmatpush3.bf16.msra.mxu1 %v1471_v18  ;;  %v1511_v56 = vpack.c.bf16 %v89_v53, %v88_v52 }
  0xf3   :  { %1328 = vmatmul.mubr.msk.f32.gmra.mrb[4].mxu1 %vm91_vm0, %v1158_v57 }
  0xf4   :  { %1330 = vmatprep.mubr.msk.f32.mxu1 %vm91_vm0, %v1159_v59  ;;  %v38_v59 = vld [vmem:[%s2009_s3 + $0x8] sm:$0xff] }
  0xf7   :  { %1331 = vmatmul.mubr.msk.f32.gmra.mrb[6].mxu1 %vm91_vm0, %v1160_v60  ;;  %v39_v60 = vld [vmem:[%s2009_s3 + $0x10] sm:$0xff] }
  0xf8   :  { %1333 = vmatprep.mubr.msk.f32.mxu1 %vm91_vm0, %v1161_v62  ;;  %v41_v62 = vld [vmem:[%s2009_s3 + $0x20] sm:$0xff] }
  0xfb   :  { %1334 = vmatmul.mubr.msk.f32.gmra.mrb[8].mxu1 %vm91_vm0, %v1162_v0  ;;  %v43_v0 = vld [vmem:[%s2009_s3 + $0x30] sm:$0xff]  ;;  %s1626_s3 = smov 32  }
  0xfc   :  { %1336 = vmatprep.mubr.msk.f32.mxu1 %vm91_vm0, %v1163_v2 }
  0xff   :  { %1337 = vmatmul.mubr.msk.f32.gmra.mrb[10].mxu1 %vm91_vm0, %v1164_v4 }
 0x100   :  { %1339 = vmatprep.mubr.msk.f32.mxu1 %vm91_vm0, %v1165_v5 }
 0x103   :  { %1340 = vmatmul.mubr.msk.f32.gmra.mrb[12].mxu1 %vm91_vm0, %v1166_v7 }
 0x104   :  { %1342 = vmatprep.mubr.msk.f32.mxu1 %vm91_vm0, %v1167_v8 }
 0x107   :  { %1343 = vmatmul.mubr.msk.f32.gmra.mrb[14].mxu1 %vm91_vm0, %v1168_v9 }
 0x1be   :  { %v1844_v21 = vpop.f32.mrb[0].mxu1 }
 0x1bf   :  { %v1846_v22 = vpop.f32.mrb[1].mxu1 }
 0x1c0   :  { %1373 = vmatprep.mubr.msk.f32.mxu0 %vm91_vm0, %v1846_v22 }
 0x1c1   :  { %1374 = vmatmul.mubr.msk.f32.vlgmr.msra.gmra.mrb[4].mxu0 %vm91_vm0, %v1844_v21 }
 0x1c2   :  { %1486 = vmatpush3.bf16.msra.mxu0 %v1483_v12  ;;  %v1858_v26 = vpop.f32.mrb[2].mxu1 }
 0x1c3   :  { %v1860_v28 = vpop.f32.mrb[3].mxu1  ;;  %1488 = vmatprep.subr.bf16.mxu0 %v1487_v23 }
 0x1c4   :  { %1376 = vmatprep.mubr.msk.f32.mxu0 %vm91_vm0, %v1860_v28 }
 0x1c5   :  { %1377 = vmatmul.mubr.msk.f32.gmra.mrb[6].mxu0 %vm91_vm0, %v1858_v26 }
 0x1c6   :  { %1490 = vmatpush3.bf16.msra.mxu0 %v1487_v23  ;;  %v1872_v33 = vpop.f32.mrb[4].mxu1 }
 0x1c7   :  { %v1874_v34 = vpop.f32.mrb[5].mxu1  ;;  %1492 = vmatprep.subr.bf16.mxu0 %v1491_v29 }
 0x1c8   :  { %1379 = vmatprep.mubr.msk.f32.mxu0 %vm91_vm0, %v1874_v34 }
 0x1c9   :  { %1380 = vmatmul.mubr.msk.f32.gmra.mrb[8].mxu0 %vm91_vm0, %v1872_v33 }
 0x1ca   :  { %1494 = vmatpush3.bf16.msra.mxu0 %v1491_v29  ;;  %v1886_v38 = vpop.f32.mrb[6].mxu1 }
 0x1cb   :  { %v1888_v39 = vpop.f32.mrb[7].mxu1  ;;  %1496 = vmatprep.subr.bf16.mxu0 %v1495_v35 }
 0x1cc   :  { %1382 = vmatprep.mubr.msk.f32.mxu0 %vm91_vm0, %v1888_v39 }
 0x1cd   :  { %1383 = vmatmul.mubr.msk.f32.gmra.mrb[10].mxu0 %vm91_vm0, %v1886_v38 }
 0x1ce   :  { %1498 = vmatpush3.bf16.msra.mxu0 %v1495_v35  ;;  %v1335_v44 = vpop.f32.mrb[8].mxu1  ;;  %1417 = vmatprep.mubr.f32.mxu0 %v37_v41 }
 0x1cf   :  { %v441_v45 = vpop.f32.mrb[9].mxu1  ;;  %1500 = vmatprep.subr.bf16.mxu0 %v1499_v40 }
 0x1d0   :  { %1353 = vmatprep.mubr.msk.f32.mxu1 %vm91_vm0, %v441_v45 }
 0x1d1   :  { %1354 = vmatmul.mubr.msk.f32.vlgmr.msra.gmra.mrb[16].mxu1 %vm91_vm0, %v1335_v44 }
 0x1d2   :  { %1502 = vmatpush3.bf16.msra.mxu0 %v1499_v40  ;;  %v1338_v49 = vpop.f32.mrb[10].mxu1 }
 0x1d3   :  { %v451_v50 = vpop.f32.mrb[11].mxu1  ;;  %1504 = vmatprep.subr.bf16.mxu0 %v1503_v46 }
 0x1d4   :  { %1356 = vmatprep.mubr.msk.f32.mxu1 %vm91_vm0, %v451_v50 }
 0x1d5   :  { %1357 = vmatmul.mubr.msk.f32.gmra.mrb[18].mxu1 %vm91_vm0, %v1338_v49 }
 0x1d6   :  { %1506 = vmatpush3.bf16.msra.mxu0 %v1503_v46  ;;  %v1341_v54 = vpop.f32.mrb[12].mxu1 }
 0x1d7   :  { %v461_v55 = vpop.f32.mrb[13].mxu1  ;;  %1508 = vmatprep.subr.bf16.mxu0 %v1507_v51 }
 0x1d8   :  { %1359 = vmatprep.mubr.msk.f32.mxu1 %vm91_vm0, %v461_v55 }
 0x1d9   :  { %1360 = vmatmul.mubr.msk.f32.gmra.mrb[20].mxu1 %vm91_vm0, %v1341_v54 }
 0x1da   :  { %1510 = vmatpush3.bf16.msra.mxu0 %v1507_v51  ;;  %v1344_v57 = vpop.f32.mrb[14].mxu1 }
 0x1db   :  { %v471_v58 = vpop.f32.mrb[15].mxu1  ;;  %1512 = vmatprep.subr.bf16.mxu0 %v1511_v56 }
 0x1dc   :  { %1362 = vmatprep.mubr.msk.f32.mxu1 %vm91_vm0, %v471_v58 }
 0x1dd   :  { %1363 = vmatmul.mubr.msk.f32.gmra.mrb[22].mxu1 %vm91_vm0, %v1344_v57 }
 0x1de   :  { %1514 = vmatpush3.bf16.msra.mxu0 %v1511_v56 }
 0x1e1   :  { %1418 = vmatmul.mubr.f32.vlgmr.msra.gmra.mrb[4].mxu0 %v38_v59 }
 0x1e2   :  { %1420 = vmatprep.mubr.f32.mxu0 %v39_v60 }
 0x1e5   :  { %1421 = vmatmul.mubr.f32.gmra.mrb[6].mxu0 %v40_v61 }
 0x1e6   :  { %1423 = vmatprep.mubr.f32.mxu0 %v41_v62 }
 0x1e9   :  { %1424 = vmatmul.mubr.f32.gmra.mrb[8].mxu0 %v42_v63 }
 0x1ea   :  { %1426 = vmatprep.mubr.f32.mxu0 %v43_v0 }
 0x1ed   :  { %1427 = vmatmul.mubr.f32.gmra.mrb[10].mxu0 %v44_v1 }
 0x2a4   :  { %v1355_v2 = vpop.f32.mrb[16].mxu1 }
 0x2a5   :  { %v570_v3 = vpop.f32.mrb[17].mxu1 }
 0x2a8   :  { %v1358_v4 = vpop.f32.mrb[18].mxu1 }
 0x2a9   :  { %v580_v5 = vpop.f32.mrb[19].mxu1 }
 0x2ac   :  { %v1361_v6 = vpop.f32.mrb[20].mxu1 }
 0x2ad   :  { %v590_v7 = vpop.f32.mrb[21].mxu1 }
 0x2b0   :  { %v1364_v8 = vpop.f32.mrb[22].mxu1 }
 0x2b1   :  { %v600_v9 = vpop.f32.mrb[23].mxu1 }
 0x2b4   :  { %v1419_v11 = vpop.f32.mrb[4].mxu0 }
 0x2b5   :  { %v1531_v12 = vadd.f32 %v1419_v11, %v1355_v2  ;;  %v804_v13 = vpop.f32.mrb[5].mxu0 }
 0x2b6   :  { %v1532_v14 = vadd.f32 %v804_v13, %v570_v3 }
 0x2b7   :  { %v858_v15 = vadd.f32 %v1531_v12, %v1201_v10 }
 0x2b8   :  { %v857_v16 = vadd.f32 %v1532_v14, %v1201_v10  ;;  %v1422_v17 = vpop.f32.mrb[6].mxu0 }
 0x2b9   :  { %v874_v18 = vmul.f32 0.2, %v858_v15  ;;  %v1533_v19 = vadd.f32 %v1422_v17, %v1358_v4  ;;  %v814_v20 = vpop.f32.mrb[7].mxu0  ;;  %vm866_vm2 = vcmp.ge.f32.partialorder %v858_v15, 0.0 }
 0x2ba   :  { %v1534_v23 = vadd.f32 %v814_v20, %v580_v5  ;;  %v873_v24 = vmul.f32 0.2, %v857_v16  ;;  %vm865_vm3 = vcmp.ge.f32.partialorder %v857_v16, 0.0 }
 0x2bb   :  { %v860_v25 = vadd.f32 %v1533_v19, %v1201_v10  ;;  %v1947_v31 = vsel %vm866_vm2, %v858_v15, %v874_v18 }
 0x2bc   :  { %v1425_v29 = vpop.f32.mrb[8].mxu0  ;;  %v859_v36 = vadd.f32 %v1534_v23, %v1201_v10  ;;  %v890_v41 = vsel %vm91_vm0, %v1947_v31, -inf  ;;  %v881_v42 = vsel %vm865_vm3, %v857_v16, %v873_v24 }
 0x2bd   :  { %v1535_v32 = vadd.f32 %v1425_v29, %v1361_v6  ;;  %v824_v35 = vpop.f32.mrb[9].mxu0  ;;  %v876_v43 = vmul.f32 0.2, %v860_v25  ;;  %vm868_vm4 = vcmp.ge.f32.partialorder %v860_v25, 0.0  ;;  %v889_v52 = vsel %vm91_vm0, %v881_v42, -inf }
 0x2be   :  { %v1536_v37 = vadd.f32 %v824_v35, %v590_v7  ;;  %v875_v49 = vmul.f32 0.2, %v859_v36  ;;  %vm867_vm7 = vcmp.ge.f32.partialorder %v859_v36, 0.0 }
 0x2bf   :  { %v862_v40 = vadd.f32 %v1535_v32, %v1201_v10  ;;  %v884_v55 = vsel %vm868_vm4, %v860_v25, %v876_v43 }
 0x2c0   :  { %v861_v44 = vadd.f32 %v1536_v37, %v1201_v10  ;;  %v1428_v45 = vpop.f32.mrb[10].mxu0  ;;  %v883_v62 = vsel %vm867_vm7, %v859_v36, %v875_v49  ;;  %v892_v2 = vsel %vm91_vm0, %v884_v55, -inf }
 0x2c1   :  { %vm870_vm5 = vcmp.ge.f32.partialorder %v862_v40, 0.0  ;;  %v878_v46 = vmul.f32 0.2, %v862_v40  ;;  %v1537_v47 = vadd.f32 %v1428_v45, %v1364_v8  ;;  %v834_v48 = vpop.f32.mrb[11].mxu0  ;;  %v891_v6 = vsel %vm91_vm0, %v883_v62, -inf }
 0x2c2   :  { %vm869_vm6 = vcmp.ge.f32.partialorder %v861_v44, 0.0  ;;  %v877_v50 = vmul.f32 0.2, %v861_v44  ;;  %v1538_v51 = vadd.f32 %v834_v48, %v600_v9 }
 0x2c3   :  { %v886_v53 = vsel %vm870_vm5, %v862_v40, %v878_v46  ;;  %v864_v54 = vadd.f32 %v1537_v47, %v1201_v10 }
 0x2c4   :  { %v895_v56 = vsel %vm91_vm0, %v886_v53, -inf  ;;  %v885_v57 = vsel %vm869_vm6, %v861_v44, %v877_v50  ;;  %v863_v58 = vadd.f32 %v1538_v51, %v1201_v10 }
 0x2c5   :  { %v896_v59 = vmax.f32 %v890_v41, %v895_v56  ;;  %v893_v60 = vsel %vm91_vm0, %v885_v57, -inf  ;;  %vm872_vm8 = vcmp.ge.f32.partialorder %v864_v54, 0.0  ;;  %v880_v61 = vmul.f32 0.2, %v864_v54 }
 0x2c6   :  { %v894_v63 = vmax.f32 %v889_v52, %v893_v60  ;;  %vm871_vm9 = vcmp.ge.f32.partialorder %v863_v58, 0.0  ;;  %v879_v0 = vmul.f32 0.2, %v863_v58 }
 0x2c7   :  { %v888_v1 = vsel %vm872_vm8, %v864_v54, %v880_v61  ;;  %v935_v61 = vshrl.u32 %v189_v27, 7 }
 0x2c8   :  { %v901_v3 = vmax.f32 %v894_v63, %v896_v59  ;;  %v899_v4 = vsel %vm91_vm0, %v888_v1, -inf  ;;  %v887_v5 = vsel %vm871_vm9, %v863_v58, %v879_v0 }
 0x2c9   :  { %v900_v7 = vmax.f32 %v892_v2, %v899_v4  ;;  %v897_v8 = vsel %vm91_vm0, %v887_v5, -inf }
 0x2ca   :  { %v898_v9 = vmax.f32 %v891_v6, %v897_v8 }
 0x2cc   :  { %v902_v10 = vmax.f32 %v898_v9, %v900_v7 }
 0x2ce   :  { %v903_v11 = vmax.f32 %v901_v3, %v902_v10 }
 0x2d0   :  { %v904_v12 = vrot.slane %v903_v11, 4 }
 0x2d2   :  { %v905_v13 = vmax.f32 %v903_v11, %v904_v12 }
 0x2d4   :  { %v906_v14 = vrot.slane %v905_v13, 2 }
 0x2d6   :  { %v907_v15 = vmax.f32 %v905_v13, %v906_v14 }
 0x2d8   :  { %v908_v16 = vrot.slane %v907_v15, 1 }
 0x2da   :  { %v909_v17 = vmax.f32 %v907_v15, %v908_v16 }
 0x2dc   :  { %v916_v18 = vsub.f32 %v887_v5, %v909_v17  ;;  %v912_v19 = vsub.f32 %v883_v62, %v909_v17  ;;  %v913_v20 = vsub.f32 %v884_v55, %v909_v17  ;;  %v910_v23 = vsub.f32 %v881_v42, %v909_v17 }
 0x2dd   :  { %v911_v24 = vsub.f32 %v1947_v31, %v909_v17  ;;  %v917_v25 = vsub.f32 %v888_v1, %v909_v17  ;;  %v914_v29 = vsub.f32 %v885_v57, %v909_v17  ;;  %v915_v32 = vsub.f32 %v886_v53, %v909_v17 }
 0x2de   :  { %v930_v35 = vmul.f32 1.442695, %v916_v18  ;;  %v922_v36 = vmul.f32 1.442695, %v912_v19  ;;  %v924_v37 = vmul.f32 1.442695, %v913_v20 }
 0x2df   :  { %v918_v40 = vmul.f32 1.442695, %v910_v23  ;;  %v920_v41 = vmul.f32 1.442695, %v911_v24  ;;  %v932_v43 = vmul.f32 1.442695, %v917_v25 }
 0x2e0   :  { %1576 = vpow2.f32 %v930_v35  ;;  %v926_v44 = vmul.f32 1.442695, %v914_v29  ;;  %v928_v45 = vmul.f32 1.442695, %v915_v32  ;;  %v937_v62 = vadd.s32 16, %v935_v61 }
 0x2e1   :  { %1578 = vpow2.f32 %v922_v36 }
 0x2e2   :  { %1580 = vpow2.f32 %v924_v37 }
 0x2e3   :  { %1582 = vpow2.f32 %v918_v40 }
 0x2e4   :  { %1584 = vpow2.f32 %v920_v41 }
 0x2e5   :  { %1586 = vpow2.f32 %v932_v43 }
 0x2e6   :  { %1588 = vpow2.f32 %v926_v44 }
 0x2e7   :  { %1590 = vpow2.f32 %v928_v45 }
 0x2ea   :  { %v1577_v31 = vpop.eup %1576 }
 0x2eb   :  { %v1579_v42 = vpop.eup %1578  ;;  %v961_v46 = vmul.f32 %v1577_v31, %v1888_v39 }
 0x2ec   :  { %v1581_v47 = vpop.eup %1580  ;;  %v957_v48 = vmul.f32 %v1579_v42, %v1860_v28 }
 0x2ed   :  { %v1583_v49 = vpop.eup %1582  ;;  %v1561_v50 = vpack.i.bf16 %v1581_v47, %v1579_v42  ;;  %v958_v51 = vmul.f32 %v1581_v47, %v1858_v26 }
 0x2ee   :  { %v1585_v52 = vpop.eup %1584  ;;  %v955_v53 = vmul.f32 %v1583_v49, %v1846_v22  ;;  %v1202_v22 = vld [vmem:[%s2007_s1] ss:$0 sm:$0xff]  ;;  %s1627_s1 = smov 96  }
 0x2ef   :  { %v1587_v54 = vpop.eup %1586  ;;  %1562 = vrot.lane.b32.xlu1 %v1561_v50, %s1626_s3  ;;  %v1556_v55 = vpack.i.bf16 %v1585_v52, %v1583_v49  ;;  %v956_v56 = vmul.f32 %v1585_v52, %v1844_v21  ;;  %vm943_vm11 = vcmp.eq.s32.totalorder %v935_v61, %v1202_v22  ;;  %v936_v21 = vadd.s32 8, %v935_v61 }
 0x2f0   :  { %v1589_v57 = vpop.eup %1588  ;;  %v1571_v58 = vpack.i.bf16 %v1587_v54, %v1577_v31  ;;  %v962_v39 = vmul.f32 %v1587_v54, %v1886_v38  ;;  %v1203_v38 = vsel %vm943_vm11, 1.0, %v1625_v30  ;;  %vm945_vm13 = vcmp.eq.s32.totalorder %v937_v62, %v1202_v22 }
 0x2f1   :  { %v1591_v59 = vpop.eup %1590  ;;  %1557 = vrot.lane.b32.xlu0 %v1556_v55, %s1626_s3  ;;  %v959_v28 = vmul.f32 %v1589_v57, %v1874_v34  ;;  %1445 = vmatprep.mubr.msk.f32.mxu1 %vm1003_vm10, %v1203_v38  ;;  %vm944_vm12 = vcmp.eq.s32.totalorder %v936_v21, %v1202_v22  ;;  %v938_v34 = vadd.s32 24, %v935_v61  ;;  %v1205_v24 = vsel %vm945_vm13, 1.0, %v1625_v30 }
 0x2f2   :  { %v1566_v60 = vpack.i.bf16 %v1591_v59, %v1589_v57  ;;  %v960_v26 = vmul.f32 %v1591_v59, %v1872_v33  ;;  %v1204_v23 = vsel %vm944_vm12, 1.0, %v1625_v30 }
 0x2f3   :  { %1572 = vrot.lane.b32.xlu1 %v1571_v58, %s1626_s3  ;;  %vm946_vm14 = vcmp.eq.s32.totalorder %v938_v34, %v1202_v22 }
 0x2f4   :  { %v1206_v25 = vsel %vm946_vm14, 1.0, %v1625_v30 }
 0x2f5   :  { %1567 = vrot.lane.b32.xlu0 %v1566_v60, %s1626_s3 }
 0x361   :  { %v1563_v33 = vpop.permute.xlu1 %1562 }
 0x362   :  { %v1565_v63 = vunpack.i.h.bf16 %v1563_v33  ;;  %v1564_v0 = vunpack.i.l.bf16 %v1563_v33 }
 0x363   :  { %v1558_v1 = vpop.permute.xlu0 %1557 }
 0x364   :  { %v1560_v2 = vunpack.i.h.bf16 %v1558_v1  ;;  %v1559_v3 = vunpack.i.l.bf16 %v1558_v1  ;;  %v997_v27 = vsel %vm91_vm0, %v957_v48, %v1564_v0  ;;  %v998_v4 = vsel %vm91_vm0, %v958_v51, %v1565_v63 }
 0x365   :  { %v1573_v5 = vpop.permute.xlu1 %1572  ;;  %v1519_v6 = vpack.c.bf16 %v998_v4, %v997_v27 }
 0x366   :  { %v1575_v7 = vunpack.i.h.bf16 %v1573_v5  ;;  %v1574_v8 = vunpack.i.l.bf16 %v1573_v5  ;;  %v995_v9 = vsel %vm91_vm0, %v955_v53, %v1559_v3  ;;  %v996_v10 = vsel %vm91_vm0, %v956_v56, %v1560_v2 }
 0x367   :  { %v1568_v11 = vpop.permute.xlu0 %1567  ;;  %v1515_v12 = vpack.c.bf16 %v996_v10, %v995_v9 }
 0x368   :  { %v1570_v13 = vunpack.i.h.bf16 %v1568_v11  ;;  %v1569_v14 = vunpack.i.l.bf16 %v1568_v11  ;;  %v1001_v15 = vsel %vm91_vm0, %v961_v46, %v1574_v8  ;;  %v1002_v16 = vsel %vm91_vm0, %v962_v39, %v1575_v7 }
 0x369   :  { %1516 = vmatprep.subr.bf16.mxu1 %v1515_v12  ;;  %v1527_v17 = vpack.c.bf16 %v1002_v16, %v1001_v15 }
 0x36a   :  { %1518 = vmatpush3.bf16.msra.mxu1 %v1515_v12  ;;  %v999_v18 = vsel %vm91_vm0, %v959_v28, %v1569_v14  ;;  %v1000_v19 = vsel %vm91_vm0, %v960_v26, %v1570_v13 }
 0x36b   :  { %1520 = vmatprep.subr.bf16.mxu1 %v1519_v6  ;;  %v1523_v20 = vpack.c.bf16 %v1000_v19, %v999_v18 }
 0x36e   :  { %1522 = vmatpush3.bf16.msra.mxu1 %v1519_v6 }
 0x36f   :  { %1524 = vmatprep.subr.bf16.mxu1 %v1523_v20 }
 0x372   :  { %1526 = vmatpush3.bf16.msra.mxu1 %v1523_v20 }
 0x373   :  { %1528 = vmatprep.subr.bf16.mxu1 %v1527_v17 }
 0x376   :  { %1530 = vmatpush3.bf16.msra.mxu1 %v1527_v17 }
 0x379   :  { %1446 = vmatmul.mubr.msk.f32.vlgmr.msra.gmra.mrb[24].mxu1 %vm1003_vm10, %v1204_v23 }
 0x37a   :  { %1448 = vmatprep.mubr.msk.f32.mxu1 %vm1003_vm10, %v1205_v24 }
 0x37d   :  { %1449 = vmatmul.mubr.msk.f32.gmra.mrb[26].mxu1 %vm1003_vm10, %v1206_v25 }
 0x44c   :  { %v1447_v29 = vpop.f32.mrb[24].mxu1 }
 0x44d   :  { %v1102_v32 = vadd.f32 1e-08, %v1447_v29  ;;  %v1082_v35 = vpop.f32.mrb[25].mxu1 }
 0x44e   :  { %v1101_v36 = vadd.f32 1e-08, %v1082_v35 }
 0x44f   :  { %1111 = vrot.lane.b32.xlu1 %v1102_v32, %s1627_s1 }
 0x450   :  { %1109 = vrot.lane.b32.xlu0 %v1101_v36, %s1627_s1  ;;  %v1450_v37 = vpop.f32.mrb[26].mxu1 }
 0x451   :  { %v1104_v40 = vadd.f32 1e-08, %v1450_v37  ;;  %v1092_v41 = vpop.f32.mrb[27].mxu1 }
 0x452   :  { %v1103_v43 = vadd.f32 1e-08, %v1092_v41 }
 0x453   :  { %1115 = vrot.lane.b32.xlu1 %v1104_v40, %s1627_s1 }
 0x454   :  { %1113 = vrot.lane.b32.xlu0 %v1103_v43, %s1627_s1 }
 0x4c1   :  { %v1112_v44 = vpop.permute.xlu1 %1111 }
 0x4c2   :  { %1592 = vrcp.f32 %v1112_v44  ;;  %v1110_v45 = vpop.permute.xlu0 %1109 }
 0x4c3   :  { %1594 = vrcp.f32 %v1110_v45 }
 0x4c5   :  { %v1116_v30 = vpop.permute.xlu1 %1115 }
 0x4c6   :  { %1596 = vrcp.f32 %v1116_v30  ;;  %v1114_v31 = vpop.permute.xlu0 %1113 }
 0x4c7   :  { %1598 = vrcp.f32 %v1114_v31 }
 0x4cc   :  { %v1593_v42 = vpop.eup %1592 }
 0x4cd   :  { %v1595_v46 = vpop.eup %1594  ;;  %v1124_v47 = vmul.f32 %v1593_v42, %v1447_v29 }
 0x4ce   :  { %v1122_v48 = vmul.f32 %v1595_v46, %v1082_v35 }
 0x4cf   :  { %1130 = vst.msk [vmem:[#allocation2 + $0x8] sm:$0xff] %vm91_vm0, %v1124_v47 }
 0x4d0   :  { %v1597_v49 = vpop.eup %1596  ;;  %1129 = vst.msk [vmem:[#allocation2] sm:$0xff] %vm91_vm0, %v1122_v48 }
 0x4d1   :  { %v1599_v50 = vpop.eup %1598  ;;  %v1128_v51 = vmul.f32 %v1597_v49, %v1450_v37 }
 0x4d2   :  { %v1126_v52 = vmul.f32 %v1599_v50, %v1092_v41 }
 0x4d3   :  { %1132 = vst.msk [vmem:[#allocation2 + $0x18] sm:$0xff] %vm91_vm0, %v1128_v51 }
 0x4d4   :  { %1131 = vst.msk [vmem:[#allocation2 + $0x10] sm:$0xff] %vm91_vm0, %v1126_v52 }
 0x4d5   :  { %1611 = shalt.err (!%p1608_p4)
}
 0x4d6   :  { %s1612_s27 = scalar_lea.hbm %s2015_s9, 512 }
 0x4d7   :  { %p1613_p5 = scmp.ne.s32.totalorder %s2015_s9, %s1612_s27  ;;  %p1616_p6 = scmp.lt.u32.totalorder %s1612_s27, %s2015_s9 }
 0x4d9   :  { %p1618_p7 = pnand %p1616_p6, %p1613_p5 }
 0x4db   :  { %1621 = shalt.err (!%p1618_p7)
}
 0x4dc   :  { %s1629_s7 = smov 128   ;;  %s1630_s6 = smov 8  }
 0x4dd   :  { %1144 = dma.vmem_to_hbm [thread:$0]  %s1139_s23, 512, %s2015_s9, [#allocation3], %s1629_s7, %s1629_s7, %s1630_s6  }
 0x4de   :  { %1622 = dma.done.wait [#allocation3], 512  }
 0x4df   :  { %1623 = vsyncadd [#allocation3], 4294966784 }
 0x4e0   :  { %1148 = vsyncpa [#allocation3], 1 }

</bundles_post_ra>
